<compile_context>
chip_gen: v7x
topology: tpu7x:2x2x1
jax: 0.10.0
libtpu: 0.0.40
codegen_flags: <defaults>
</compile_context>

<pallas_src>
import functools

import numpy as np
import jax
import jax.numpy as jnp
from jax import lax
from jax.experimental import pallas as pl
from jax.experimental.pallas import tpu as pltpu


# --------------------------------------------------------------------------------------
# Kernel A: fused QKV projection  (x[TS,E] @ [Wq|Wk|Wv][E,3E] + bias), head-major outputs
# --------------------------------------------------------------------------------------
def _qkv_proj_kernel(x_ref, w_ref, b_ref, q_ref, k_ref, v_ref, *, num_heads, head_dim):
    E = num_heads * head_dim
    scale = 1.0 / (head_dim ** 0.5)
    # One wide matmul with f32 MXU accumulation.
    qkv = jnp.dot(x_ref[...], w_ref[...], preferred_element_type=jnp.float32) + b_ref[...]
    # Split into heads ONCE here (mem-bound kernel: the lane slices hide under the DMAs).
    # Kernel B then only ever indexes the leading head axis.  1/sqrt(HD) folded into q.
    for h in range(num_heads):
        lo = h * head_dim
        q_ref[h] = (qkv[:, lo:lo + head_dim] * scale).astype(q_ref.dtype)
        k_ref[h] = qkv[:, E + lo:E + lo + head_dim].astype(k_ref.dtype)
        v_ref[h] = qkv[:, 2 * E + lo:2 * E + lo + head_dim].astype(v_ref.dtype)


# --------------------------------------------------------------------------------------
# Kernel B: causal flash attention (online softmax) + fused output projection
# --------------------------------------------------------------------------------------
def _flash_attn_out_kernel(qi_tab, ki_tab, q_ref, k_ref, v_ref, wo_ref, bo_ref, o_ref,
                           m_sc, l_sc, acc_sc, *,
                           num_heads, head_dim, tq, tk, unroll_heads):
    E = num_heads * head_dim
    step = pl.program_id(1)
    qi = qi_tab[step]
    ki = ki_tab[step]
    # Last kv block intersecting the causal region of this q tile.  All scheduled steps
    # satisfy ki <= last_ki by construction of the triangular schedule.
    last_ki = ((qi + 1) * tq - 1) // tk

    @pl.when(ki == 0)
    def _init():
        m_sc[...] = jnp.full_like(m_sc, -jnp.inf)
        l_sc[...] = jnp.zeros_like(l_sc)
        acc_sc[...] = jnp.zeros_like(acc_sc)

    # Global causal mask for this (q_tile, kv_tile) pair; computed once, shared by all heads.
    # For strictly-below-diagonal blocks it is all-False and the select is cheap VPU filler.
    rowg = qi * tq + lax.broadcasted_iota(jnp.int32, (tq, tk), 0)
    colg = ki * tk + lax.broadcasted_iota(jnp.int32, (tq, tk), 1)
    future = colg > rowg

    def head_step(h):
        q_h = q_ref[h]                      # [TQ, HD] (already scaled by 1/sqrt(HD))
        k_h = k_ref[h]                      # [TK, HD]
        v_h = v_ref[h]                      # [TK, HD]
        # QK^T as a contraction (K fed untransposed), f32 MXU accumulation.
        s = lax.dot_general(q_h, k_h, (((1,), (1,)), ((), ())),
                            preferred_element_type=jnp.float32)   # [TQ, TK]
        s = jnp.where(future, -jnp.inf, s)
        m_prev = m_sc[h]                                          # [TQ, 1]
        m_new = jnp.maximum(m_prev, jnp.max(s, axis=-1, keepdims=True))
        alpha = jnp.exp(m_prev - m_new)
        p = jnp.exp(s - m_new)
        l_sc[h] = alpha * l_sc[h] + jnp.sum(p, axis=-1, keepdims=True)
        acc_sc[h] = alpha * acc_sc[h] + jnp.dot(p.astype(v_h.dtype), v_h,
                                                preferred_element_type=jnp.float32)
        m_sc[h] = m_new

    if unroll_heads:
        for h in range(num_heads):
            head_step(h)
    else:
        def _body(h, carry):
            head_step(h)
            return carry
        lax.fori_loop(0, num_heads, _body, 0)

    @pl.when(ki == last_ki)
    def _finalize():
        # Normalize each head, then apply the output projection as NH K=HD matmuls against
        # Wo[NH, HD, E] (leading-axis views), accumulated in f32.  Once per q tile, amortized
        # over all of its kv steps.
        def out_head(h, y):
            inv_l = pl.reciprocal(l_sc[h], approx=False)          # [TQ, 1]
            a_h = (acc_sc[h] * inv_l).astype(wo_ref.dtype)        # [TQ, HD]
            return y + jnp.dot(a_h, wo_ref[h], preferred_element_type=jnp.float32)

        y = jnp.zeros((tq, E), jnp.float32)
        if unroll_heads:
            for h in range(num_heads):
                y = out_head(h, y)
        else:
            y = lax.fori_loop(0, num_heads, out_head, y)
        o_ref[...] = (y + bo_ref[...]).astype(o_ref.dtype)


# --------------------------------------------------------------------------------------
# Wrapper
# --------------------------------------------------------------------------------------
def _pick_tile(n, pref):
    """Largest tile <= pref that divides n and keeps the (8,128) sublane rule happy."""
    if n <= pref:
        return n
    for t in range(pref, 7, -8):
        if n % t == 0:
            return t
    return n  # fall back to the whole axis


def _vmem_limit(estimate_bytes):
    # Floor at 40 MiB (fits v7x's 64 MiB physical VMEM with headroom), grow with the tile
    # footprint, cap well under v5e/v6e physical (128 MiB).
    return int(min(96 * 1024 * 1024, max(40 * 1024 * 1024, 2 * estimate_bytes)))


def _maybe_single_buffered(block_shape, index_map, single_buffer):
    # v7x: constant-index weight/bias blocks do not need double-buffering; pl.Buffered(1)
    # halves their VMEM residency.  Off by default (proven path; v5e/v6e have headroom).
    if single_buffer:
        return pl.BlockSpec(block_shape, index_map, pipeline_mode=pl.Buffered(1))
    return pl.BlockSpec(block_shape, index_map)


def causal_mha(x, wq, wk, wv, bq, bk, bv, wo, bo, *, num_heads, head_dim,
               q_tile=None, kv_tile=None, seq_tile=None, qkv_dtype=None,
               single_buffer_weights=False):
    """x: [B, C, E]; wq/wk/wv: [E, NH*HD]; bq/bk/bv: [NH*HD]; wo: [NH*HD, E]; bo: [E]."""
    B, C, E = x.shape
    NH, HD = num_heads, head_dim
    assert NH * HD == E, "head_dim * num_heads must equal the embedding dim"
    qkv_dtype = x.dtype if qkv_dtype is None else jnp.dtype(qkv_dtype)

    # ---------------- Kernel A: fused QKV projection (head-major q/k/v) ----------------
    w_qkv = jnp.concatenate([wq, wk, wv], axis=1)                 # [E, 3E]   (layout glue)
    b_qkv = jnp.concatenate([bq, bk, bv], axis=0).reshape(1, 3 * E)

    TS = seq_tile if seq_tile is not None else _pick_tile(C, 512)
    assert C % TS == 0
    xb = x.dtype.itemsize
    qb = jnp.dtype(qkv_dtype).itemsize
    wb = w_qkv.dtype.itemsize
    est_a = (2 * (TS * E * xb + 3 * TS * E * qb)      # x tile + 3 out tiles, double-buffered
             + 2 * (E * 3 * E * wb)                   # resident fused weight
             + 4 * TS * 3 * E)                        # f32 qkv temp

    qkv_shape = jax.ShapeDtypeStruct((B, NH, C, HD), qkv_dtype)
    q, k, v = pl.pallas_call(
        functools.partial(_qkv_proj_kernel, num_heads=NH, head_dim=HD),
        out_shape=(qkv_shape, qkv_shape, qkv_shape),
        grid_spec=pltpu.PrefetchScalarGridSpec(
            num_scalar_prefetch=0,
            grid=(B, C // TS),
            in_specs=[
                pl.BlockSpec((None, TS, E), lambda b, si: (b, si, 0)),          # x
                _maybe_single_buffered((E, 3 * E), lambda b, si: (0, 0),
                                       single_buffer_weights),                   # W_qkv
                _maybe_single_buffered((1, 3 * E), lambda b, si: (0, 0),
                                       single_buffer_weights),                   # b_qkv
            ],
            out_specs=[
                pl.BlockSpec((None, NH, TS, HD), lambda b, si: (b, 0, si, 0)),   # q
                pl.BlockSpec((None, NH, TS, HD), lambda b, si: (b, 0, si, 0)),   # k
                pl.BlockSpec((None, NH, TS, HD), lambda b, si: (b, 0, si, 0)),   # v
            ],
        ),
        compiler_params=pltpu.CompilerParams(
            dimension_semantics=("parallel", "parallel"),
            vmem_limit_bytes=_vmem_limit(est_a)),
    )(x, w_qkv, b_qkv)

    # ------------- Kernel B: causal flash attention + fused output projection -------------
    TQ = q_tile if q_tile is not None else _pick_tile(C, 256)
    TK = kv_tile if kv_tile is not None else _pick_tile(C, 256)
    assert C % TQ == 0 and C % TK == 0

    # Triangular schedule: enumerate only (q_tile, kv_tile) pairs intersecting the causal
    # region.  Scalar-prefetched into SMEM; drives the q/k/v/out index_maps.
    qi_l, ki_l = [], []
    for qi in range(C // TQ):
        for ki in range(((qi + 1) * TQ - 1) // TK + 1):
            qi_l.append(qi)
            ki_l.append(ki)
    qi_tab = jnp.asarray(np.asarray(qi_l, dtype=np.int32))
    ki_tab = jnp.asarray(np.asarray(ki_l, dtype=np.int32))
    n_steps = len(qi_l)

    wo_r = wo.reshape(NH, HD, E)        # head-major Wo for leading-axis views (layout glue)
    bo_2d = bo.reshape(1, E)
    unroll_heads = NH <= 4              # unroll small NH; fori_loop bounds live ranges else

    wob = wo_r.dtype.itemsize
    est_b = (2 * (NH * TQ * HD * qb + 2 * NH * TK * HD * qb + TQ * E * xb)
             + 2 * (NH * HD * E * wob)
             + 2 * NH * TQ * 128 * 4 + NH * TQ * max(HD, 128) * 4)

    return pl.pallas_call(
        functools.partial(_flash_attn_out_kernel, num_heads=NH, head_dim=HD,
                          tq=TQ, tk=TK, unroll_heads=unroll_heads),
        out_shape=jax.ShapeDtypeStruct((B, C, E), x.dtype),
        grid_spec=pltpu.PrefetchScalarGridSpec(
            num_scalar_prefetch=2,
            grid=(B, n_steps),
            in_specs=[
                pl.BlockSpec((None, NH, TQ, HD),
                             lambda b, s, qi_t, ki_t: (b, 0, qi_t[s], 0)),       # q
                pl.BlockSpec((None, NH, TK, HD),
                             lambda b, s, qi_t, ki_t: (b, 0, ki_t[s], 0)),       # k
                pl.BlockSpec((None, NH, TK, HD),
                             lambda b, s, qi_t, ki_t: (b, 0, ki_t[s], 0)),       # v
                _maybe_single_buffered((NH, HD, E),
                                       lambda b, s, qi_t, ki_t: (0, 0, 0),
                                       single_buffer_weights),                    # Wo
                _maybe_single_buffered((1, E),
                                       lambda b, s, qi_t, ki_t: (0, 0),
                                       single_buffer_weights),                    # bo
            ],
            out_specs=pl.BlockSpec((None, TQ, E),
                                   lambda b, s, qi_t, ki_t: (b, qi_t[s], 0)),
            scratch_shapes=[
                pltpu.VMEM((NH, TQ, 1), jnp.float32),    # running max, per head
                pltpu.VMEM((NH, TQ, 1), jnp.float32),    # running denominator, per head
                pltpu.VMEM((NH, TQ, HD), jnp.float32),   # per-head output accumulator
            ],
        ),
        compiler_params=pltpu.CompilerParams(
            # B is the only parallel axis under the triangular schedule; keep B >= 2 so both
            # v7x TensorCores get balanced work.
            dimension_semantics=("parallel", "arbitrary"),
            vmem_limit_bytes=_vmem_limit(est_b)),
    )(qi_tab, ki_tab, q, k, v, wo_r, bo_2d)


# --------------------------------------------------------------------------------------
# Pure-JAX reference (matches the PyTorch module, dropout = identity)
# --------------------------------------------------------------------------------------
def reference_mha(x, wq, wk, wv, bq, bk, bv, wo, bo, *, num_heads, head_dim):
    B, C, E = x.shape
    q = (x @ wq + bq).reshape(B, C, num_heads, head_dim).transpose(0, 2, 1, 3)
    k = (x @ wk + bk).reshape(B, C, num_heads, head_dim).transpose(0, 2, 1, 3)
    v = (x @ wv + bv).reshape(B, C, num_heads, head_dim).transpose(0, 2, 1, 3)
    a = jnp.einsum("bhqd,bhkd->bhqk", q, k)
    mask = jnp.triu(jnp.ones((C, C), dtype=bool), k=1)
    a = jnp.where(mask, -jnp.inf, a)
    a = jax.nn.softmax(a / head_dim ** 0.5, axis=-1)
    y = jnp.einsum("bhqk,bhkd->bhqd", a, v)
    y = y.transpose(0, 2, 1, 3).reshape(B, C, num_heads * head_dim)
    return y @ wo + bo


if __name__ == "__main__":
    def run_case(B, C, E, NH, HD, *, q_tile=None, kv_tile=None, seq_tile=None,
                 qkv_dtype=None, atol=2e-4, rtol=2e-4, seed=0):
        key = jax.random.PRNGKey(seed)
        ks = jax.random.split(key, 9)
        scale = 0.1
        x = jax.random.normal(ks[0], (B, C, E), dtype=jnp.float32)
        wq = scale * jax.random.normal(ks[1], (E, NH * HD), dtype=jnp.float32)
        wk = scale * jax.random.normal(ks[2], (E, NH * HD), dtype=jnp.float32)
        wv = scale * jax.random.normal(ks[3], (E, NH * HD), dtype=jnp.float32)
        bq = scale * jax.random.normal(ks[4], (NH * HD,), dtype=jnp.float32)
        bk = scale * jax.random.normal(ks[5], (NH * HD,), dtype=jnp.float32)
        bv = scale * jax.random.normal(ks[6], (NH * HD,), dtype=jnp.float32)
        wo = scale * jax.random.normal(ks[7], (NH * HD, E), dtype=jnp.float32)
        bo = scale * jax.random.normal(ks[8], (E,), dtype=jnp.float32)

        out = causal_mha(x, wq, wk, wv, bq, bk, bv, wo, bo,
                         num_heads=NH, head_dim=HD, q_tile=q_tile, kv_tile=kv_tile,
                         seq_tile=seq_tile, qkv_dtype=qkv_dtype)
        jax.block_until_ready(out)
        ref = reference_mha(x, wq, wk, wv, bq, bk, bv, wo, bo,
                            num_heads=NH, head_dim=HD)
        assert out.shape == ref.shape
        assert jnp.allclose(out, ref, atol=atol, rtol=rtol), (
            f"mismatch vs reference (B={B}, C={C}, E={E}, NH={NH}, "
            f"max abs err={float(jnp.max(jnp.abs(out - ref)))})")

    # Single-tile path; config consistent with the module (att_dim = E = NH * HD).
    run_case(B=2, C=8, E=32, NH=4, HD=8, seed=0)
    # Multi-tile triangular schedule: online softmax across kv blocks, causal masking,
    # deduplicated q fetches, statically-unrolled head loop (NH <= 4).
    run_case(B=2, C=32, E=32, NH=4, HD=8, q_tile=8, kv_tile=8, seq_tile=16, seed=1)
    # fori_loop head path (NH > 4) + bf16 q/k/v intermediates (halved inter-kernel HBM
    # traffic, bf16 MXU rate); tolerance loosened accordingly.
    run_case(B=2, C=64, E=64, NH=8, HD=8, q_tile=16, kv_tile=16, seq_tile=32,
             qkv_dtype=jnp.bfloat16, atol=5e-2, rtol=5e-2, seed=2)

    print("KERNEL_OK")
</pallas_src>

<mosaic_0001>
module attributes {stable_mosaic.version = 11 : i64} {
  func.func @_qkv_proj_kernel(%arg0: i32, %arg1: i32, %arg2: memref<1x8x32xf32, #tpu.memory_space<vmem>>, %arg3: memref<32x96xf32, #tpu.memory_space<vmem>>, %arg4: memref<1x96xf32, #tpu.memory_space<vmem>>, %arg5: memref<1x4x8x8xf32, #tpu.memory_space<vmem>>, %arg6: memref<1x4x8x8xf32, #tpu.memory_space<vmem>>, %arg7: memref<1x4x8x8xf32, #tpu.memory_space<vmem>>) attributes {dimension_semantics = [#tpu.dimension_semantics<parallel>, #tpu.dimension_semantics<parallel>], iteration_bounds = array<i64: 2, 1>, scalar_prefetch = 0 : i64, scratch_operands = 0 : i64, tpu.core_type = #tpu.core_type<tc>, window_params = [{transform_indices = @transform_0, window_bounds = array<i64: 1, 8, 32>}, {pipeline_mode = #tpu.pipeline_mode<synchronous>, transform_indices = @transform_1, window_bounds = array<i64: 32, 96>}, {pipeline_mode = #tpu.pipeline_mode<synchronous>, transform_indices = @transform_2, window_bounds = array<i64: 1, 96>}, {transform_indices = @transform_3, window_bounds = array<i64: 1, 4, 8, 8>}, {transform_indices = @transform_4, window_bounds = array<i64: 1, 4, 8, 8>}, {transform_indices = @transform_5, window_bounds = array<i64: 1, 4, 8, 8>}]} {
    %c0 = arith.constant 0 : index
    %c0_0 = arith.constant 0 : index
    %c0_1 = arith.constant 0 : index
    %0 = vector.load %arg2[%c0, %c0_0, %c0_1] : memref<1x8x32xf32, #tpu.memory_space<vmem>>, vector<1x8x32xf32>
    %1 = vector.shape_cast %0 : vector<1x8x32xf32> to vector<8x32xf32>
    %c0_2 = arith.constant 0 : index
    %c0_3 = arith.constant 0 : index
    %2 = vector.load %arg3[%c0_2, %c0_3] : memref<32x96xf32, #tpu.memory_space<vmem>>, vector<32x96xf32>
    %cst = arith.constant dense<0.000000e+00> : vector<8x96xf32>
    %3 = tpu.matmul %1, %2, %cst {dimension_numbers = #tpu.dot_dimension_numbers<[1], [0], [0], [1], [0, 0, 1, 1], [], []>} : vector<8x32xf32>, vector<32x96xf32>, vector<8x96xf32> -> vector<8x96xf32>
    %c0_4 = arith.constant 0 : index
    %c0_5 = arith.constant 0 : index
    %4 = vector.load %arg4[%c0_4, %c0_5] : memref<1x96xf32, #tpu.memory_space<vmem>>, vector<1x96xf32>
    %5 = vector.broadcast %4 : vector<1x96xf32> to vector<8x96xf32>
    %6 = arith.addf %3, %5 : vector<8x96xf32>
    %7 = vector.extract_strided_slice %6 {offsets = [0, 0], sizes = [8, 8], strides = [1, 1]} : vector<8x96xf32> to vector<8x8xf32>
    %cst_6 = arith.constant 0.353553385 : f32
    %8 = vector.broadcast %cst_6 : f32 to vector<8x8xf32>
    %9 = arith.mulf %7, %8 : vector<8x8xf32>
    %c0_7 = arith.constant 0 : index
    %c0_8 = arith.constant 0 : index
    %c0_9 = arith.constant 0 : index
    %c0_10 = arith.constant 0 : index
    %10 = vector.load %arg5[%c0_7, %c0_8, %c0_9, %c0_10] : memref<1x4x8x8xf32, #tpu.memory_space<vmem>>, vector<1x1x8x8xf32>
    %11 = vector.shape_cast %10 : vector<1x1x8x8xf32> to vector<8x8xf32>
    %12 = vector.shape_cast %9 : vector<8x8xf32> to vector<1x1x8x8xf32>
    tpu.vector_store %arg5[%c0_7, %c0_8, %c0_9, %c0_10], %12 {strides = array<i32>} : memref<1x4x8x8xf32, #tpu.memory_space<vmem>>, vector<1x1x8x8xf32>,
    %13 = vector.extract_strided_slice %6 {offsets = [0, 32], sizes = [8, 8], strides = [1, 1]} : vector<8x96xf32> to vector<8x8xf32>
    %c0_11 = arith.constant 0 : index
    %c0_12 = arith.constant 0 : index
    %c0_13 = arith.constant 0 : index
    %c0_14 = arith.constant 0 : index
    %14 = vector.load %arg6[%c0_11, %c0_12, %c0_13, %c0_14] : memref<1x4x8x8xf32, #tpu.memory_space<vmem>>, vector<1x1x8x8xf32>
    %15 = vector.shape_cast %14 : vector<1x1x8x8xf32> to vector<8x8xf32>
    %16 = vector.shape_cast %13 : vector<8x8xf32> to vector<1x1x8x8xf32>
    tpu.vector_store %arg6[%c0_11, %c0_12, %c0_13, %c0_14], %16 {strides = array<i32>} : memref<1x4x8x8xf32, #tpu.memory_space<vmem>>, vector<1x1x8x8xf32>,
    %17 = vector.extract_strided_slice %6 {offsets = [0, 64], sizes = [8, 8], strides = [1, 1]} : vector<8x96xf32> to vector<8x8xf32>
    %c0_15 = arith.constant 0 : index
    %c0_16 = arith.constant 0 : index
    %c0_17 = arith.constant 0 : index
    %c0_18 = arith.constant 0 : index
    %18 = vector.load %arg7[%c0_15, %c0_16, %c0_17, %c0_18] : memref<1x4x8x8xf32, #tpu.memory_space<vmem>>, vector<1x1x8x8xf32>
    %19 = vector.shape_cast %18 : vector<1x1x8x8xf32> to vector<8x8xf32>
    %20 = vector.shape_cast %17 : vector<8x8xf32> to vector<1x1x8x8xf32>
    tpu.vector_store %arg7[%c0_15, %c0_16, %c0_17, %c0_18], %20 {strides = array<i32>} : memref<1x4x8x8xf32, #tpu.memory_space<vmem>>, vector<1x1x8x8xf32>,
    %21 = vector.extract_strided_slice %6 {offsets = [0, 8], sizes = [8, 8], strides = [1, 1]} : vector<8x96xf32> to vector<8x8xf32>
    %cst_19 = arith.constant 0.353553385 : f32
    %22 = vector.broadcast %cst_19 : f32 to vector<8x8xf32>
    %23 = arith.mulf %21, %22 : vector<8x8xf32>
    %c0_20 = arith.constant 0 : index
    %c1 = arith.constant 1 : index
    %c0_21 = arith.constant 0 : index
    %c0_22 = arith.constant 0 : index
    %24 = vector.load %arg5[%c0_20, %c1, %c0_21, %c0_22] : memref<1x4x8x8xf32, #tpu.memory_space<vmem>>, vector<1x1x8x8xf32>
    %25 = vector.shape_cast %24 : vector<1x1x8x8xf32> to vector<8x8xf32>
    %26 = vector.shape_cast %23 : vector<8x8xf32> to vector<1x1x8x8xf32>
    tpu.vector_store %arg5[%c0_20, %c1, %c0_21, %c0_22], %26 {strides = array<i32>} : memref<1x4x8x8xf32, #tpu.memory_space<vmem>>, vector<1x1x8x8xf32>,
    %27 = vector.extract_strided_slice %6 {offsets = [0, 40], sizes = [8, 8], strides = [1, 1]} : vector<8x96xf32> to vector<8x8xf32>
    %c0_23 = arith.constant 0 : index
    %c1_24 = arith.constant 1 : index
    %c0_25 = arith.constant 0 : index
    %c0_26 = arith.constant 0 : index
    %28 = vector.load %arg6[%c0_23, %c1_24, %c0_25, %c0_26] : memref<1x4x8x8xf32, #tpu.memory_space<vmem>>, vector<1x1x8x8xf32>
    %29 = vector.shape_cast %28 : vector<1x1x8x8xf32> to vector<8x8xf32>
    %30 = vector.shape_cast %27 : vector<8x8xf32> to vector<1x1x8x8xf32>
    tpu.vector_store %arg6[%c0_23, %c1_24, %c0_25, %c0_26], %30 {strides = array<i32>} : memref<1x4x8x8xf32, #tpu.memory_space<vmem>>, vector<1x1x8x8xf32>,
    %31 = vector.extract_strided_slice %6 {offsets = [0, 72], sizes = [8, 8], strides = [1, 1]} : vector<8x96xf32> to vector<8x8xf32>
    %c0_27 = arith.constant 0 : index
    %c1_28 = arith.constant 1 : index
    %c0_29 = arith.constant 0 : index
    %c0_30 = arith.constant 0 : index
    %32 = vector.load %arg7[%c0_27, %c1_28, %c0_29, %c0_30] : memref<1x4x8x8xf32, #tpu.memory_space<vmem>>, vector<1x1x8x8xf32>
    %33 = vector.shape_cast %32 : vector<1x1x8x8xf32> to vector<8x8xf32>
    %34 = vector.shape_cast %31 : vector<8x8xf32> to vector<1x1x8x8xf32>
    tpu.vector_store %arg7[%c0_27, %c1_28, %c0_29, %c0_30], %34 {strides = array<i32>} : memref<1x4x8x8xf32, #tpu.memory_space<vmem>>, vector<1x1x8x8xf32>,
    %35 = vector.extract_strided_slice %6 {offsets = [0, 16], sizes = [8, 8], strides = [1, 1]} : vector<8x96xf32> to vector<8x8xf32>
    %cst_31 = arith.constant 0.353553385 : f32
    %36 = vector.broadcast %cst_31 : f32 to vector<8x8xf32>
    %37 = arith.mulf %35, %36 : vector<8x8xf32>
    %c0_32 = arith.constant 0 : index
    %c2 = arith.constant 2 : index
    %c0_33 = arith.constant 0 : index
    %c0_34 = arith.constant 0 : index
    %38 = vector.load %arg5[%c0_32, %c2, %c0_33, %c0_34] : memref<1x4x8x8xf32, #tpu.memory_space<vmem>>, vector<1x1x8x8xf32>
    %39 = vector.shape_cast %38 : vector<1x1x8x8xf32> to vector<8x8xf32>
    %40 = vector.shape_cast %37 : vector<8x8xf32> to vector<1x1x8x8xf32>
    tpu.vector_store %arg5[%c0_32, %c2, %c0_33, %c0_34], %40 {strides = array<i32>} : memref<1x4x8x8xf32, #tpu.memory_space<vmem>>, vector<1x1x8x8xf32>,
    %41 = vector.extract_strided_slice %6 {offsets = [0, 48], sizes = [8, 8], strides = [1, 1]} : vector<8x96xf32> to vector<8x8xf32>
    %c0_35 = arith.constant 0 : index
    %c2_36 = arith.constant 2 : index
    %c0_37 = arith.constant 0 : index
    %c0_38 = arith.constant 0 : index
    %42 = vector.load %arg6[%c0_35, %c2_36, %c0_37, %c0_38] : memref<1x4x8x8xf32, #tpu.memory_space<vmem>>, vector<1x1x8x8xf32>
    %43 = vector.shape_cast %42 : vector<1x1x8x8xf32> to vector<8x8xf32>
    %44 = vector.shape_cast %41 : vector<8x8xf32> to vector<1x1x8x8xf32>
    tpu.vector_store %arg6[%c0_35, %c2_36, %c0_37, %c0_38], %44 {strides = array<i32>} : memref<1x4x8x8xf32, #tpu.memory_space<vmem>>, vector<1x1x8x8xf32>,
    %45 = vector.extract_strided_slice %6 {offsets = [0, 80], sizes = [8, 8], strides = [1, 1]} : vector<8x96xf32> to vector<8x8xf32>
    %c0_39 = arith.constant 0 : index
    %c2_40 = arith.constant 2 : index
    %c0_41 = arith.constant 0 : index
    %c0_42 = arith.constant 0 : index
    %46 = vector.load %arg7[%c0_39, %c2_40, %c0_41, %c0_42] : memref<1x4x8x8xf32, #tpu.memory_space<vmem>>, vector<1x1x8x8xf32>
    %47 = vector.shape_cast %46 : vector<1x1x8x8xf32> to vector<8x8xf32>
    %48 = vector.shape_cast %45 : vector<8x8xf32> to vector<1x1x8x8xf32>
    tpu.vector_store %arg7[%c0_39, %c2_40, %c0_41, %c0_42], %48 {strides = array<i32>} : memref<1x4x8x8xf32, #tpu.memory_space<vmem>>, vector<1x1x8x8xf32>,
    %49 = vector.extract_strided_slice %6 {offsets = [0, 24], sizes = [8, 8], strides = [1, 1]} : vector<8x96xf32> to vector<8x8xf32>
    %cst_43 = arith.constant 0.353553385 : f32
    %50 = vector.broadcast %cst_43 : f32 to vector<8x8xf32>
    %51 = arith.mulf %49, %50 : vector<8x8xf32>
    %c0_44 = arith.constant 0 : index
    %c3 = arith.constant 3 : index
    %c0_45 = arith.constant 0 : index
    %c0_46 = arith.constant 0 : index
    %52 = vector.load %arg5[%c0_44, %c3, %c0_45, %c0_46] : memref<1x4x8x8xf32, #tpu.memory_space<vmem>>, vector<1x1x8x8xf32>
    %53 = vector.shape_cast %52 : vector<1x1x8x8xf32> to vector<8x8xf32>
    %54 = vector.shape_cast %51 : vector<8x8xf32> to vector<1x1x8x8xf32>
    tpu.vector_store %arg5[%c0_44, %c3, %c0_45, %c0_46], %54 {strides = array<i32>} : memref<1x4x8x8xf32, #tpu.memory_space<vmem>>, vector<1x1x8x8xf32>,
    %55 = vector.extract_strided_slice %6 {offsets = [0, 56], sizes = [8, 8], strides = [1, 1]} : vector<8x96xf32> to vector<8x8xf32>
    %c0_47 = arith.constant 0 : index
    %c3_48 = arith.constant 3 : index
    %c0_49 = arith.constant 0 : index
    %c0_50 = arith.constant 0 : index
    %56 = vector.load %arg6[%c0_47, %c3_48, %c0_49, %c0_50] : memref<1x4x8x8xf32, #tpu.memory_space<vmem>>, vector<1x1x8x8xf32>
    %57 = vector.shape_cast %56 : vector<1x1x8x8xf32> to vector<8x8xf32>
    %58 = vector.shape_cast %55 : vector<8x8xf32> to vector<1x1x8x8xf32>
    tpu.vector_store %arg6[%c0_47, %c3_48, %c0_49, %c0_50], %58 {strides = array<i32>} : memref<1x4x8x8xf32, #tpu.memory_space<vmem>>, vector<1x1x8x8xf32>,
    %59 = vector.extract_strided_slice %6 {offsets = [0, 88], sizes = [8, 8], strides = [1, 1]} : vector<8x96xf32> to vector<8x8xf32>
    %c0_51 = arith.constant 0 : index
    %c3_52 = arith.constant 3 : index
    %c0_53 = arith.constant 0 : index
    %c0_54 = arith.constant 0 : index
    %60 = vector.load %arg7[%c0_51, %c3_52, %c0_53, %c0_54] : memref<1x4x8x8xf32, #tpu.memory_space<vmem>>, vector<1x1x8x8xf32>
    %61 = vector.shape_cast %60 : vector<1x1x8x8xf32> to vector<8x8xf32>
    %62 = vector.shape_cast %59 : vector<8x8xf32> to vector<1x1x8x8xf32>
    tpu.vector_store %arg7[%c0_51, %c3_52, %c0_53, %c0_54], %62 {strides = array<i32>} : memref<1x4x8x8xf32, #tpu.memory_space<vmem>>, vector<1x1x8x8xf32>,
    return
  }
  func.func @transform_0(%arg0: i32, %arg1: i32) -> (i32, i32, i32) {
    %c0_i32 = arith.constant 0 : i32
    %c0_i32_0 = arith.constant 0 : i32
    return %arg0, %arg1, %c0_i32 : i32, i32, i32
  }
  func.func @transform_1(%arg0: i32, %arg1: i32) -> (i32, i32) {
    %c0_i32 = arith.constant 0 : i32
    %c0_i32_0 = arith.constant 0 : i32
    %c0_i32_1 = arith.constant 0 : i32
    return %c0_i32, %c0_i32_0 : i32, i32
  }
  func.func @transform_2(%arg0: i32, %arg1: i32) -> (i32, i32) {
    %c0_i32 = arith.constant 0 : i32
    %c0_i32_0 = arith.constant 0 : i32
    %c0_i32_1 = arith.constant 0 : i32
    return %c0_i32, %c0_i32_0 : i32, i32
  }
  func.func @transform_3(%arg0: i32, %arg1: i32) -> (i32, i32, i32, i32) {
    %c0_i32 = arith.constant 0 : i32
    %c0_i32_0 = arith.constant 0 : i32
    %c0_i32_1 = arith.constant 0 : i32
    return %arg0, %c0_i32, %arg1, %c0_i32_0 : i32, i32, i32, i32
  }
  func.func @transform_4(%arg0: i32, %arg1: i32) -> (i32, i32, i32, i32) {
    %c0_i32 = arith.constant 0 : i32
    %c0_i32_0 = arith.constant 0 : i32
    %c0_i32_1 = arith.constant 0 : i32
    return %arg0, %c0_i32, %arg1, %c0_i32_0 : i32, i32, i32, i32
  }
  func.func @transform_5(%arg0: i32, %arg1: i32) -> (i32, i32, i32, i32) {
    %c0_i32 = arith.constant 0 : i32
    %c0_i32_0 = arith.constant 0 : i32
    %c0_i32_1 = arith.constant 0 : i32
    return %arg0, %c0_i32, %arg1, %c0_i32_0 : i32, i32, i32, i32
  }
}

</mosaic_0001>

<bundles_post_ra>
// kernel: tpu_custom_call.1
= control target key start
LH: loop header
LB: loop body
LE: loop exit
PB: predicated region body
PF: predicated region fallthrough
CT: control target
= control target key end

     0   :  { %11 = vsyncpa [#allocation3], 0  ;;  %s1404_s0 = inlined_call_operand.hbm [shape: f32[2,8,32], index: 0, kind: input, shape index: {}]   ;;  %s1405_s1 = inlined_call_operand.hbm [shape: f32[32,96], index: 1, kind: input, shape index: {}]   ;;  %s1406_s2 = inlined_call_operand.vmem [shape: f32[1,96], index: 2, kind: input, shape index: {}]   ;;  %s1407_s3 = inlined_call_operand.hbm [shape: f32[2,4,8,8], index: 3, kind: output, shape index: {0}]   ;;  %s1408_s4 = inlined_call_operand.hbm [shape: f32[2,4,8,8], index: 4, kind: output, shape index: {1}]   ;;  %s1409_s5 = inlined_call_operand.hbm [shape: f32[2,4,8,8], index: 5, kind: output, shape index: {2}]  }
   0x1   :  { %13 = vsyncpa [#allocation3 + $0x1], 0 }
   0x2   :  { %14 = vsyncpa [#allocation6], 0 }
   0x3   :  { %15 = vsyncpa [#allocation4], 0 }
   0x4   :  { %17 = vsyncpa [#allocation4 + $0x1], 0 }
   0x5   :  { %18 = vsyncpa [#allocation9], 0 }
   0x6   :  { %20 = vsyncpa [#allocation9 + $0x1], 0  ;;  %s1076_s18 = smov 0   ;;  %s1078_s19 = smov 0  }
   0x7   :  { %s1080_s20 = smov 0   ;;  %s1082_s21 = smov 0  }
   0x8   :  { %s1084_s22 = smov 0   ;;  %s1086_s23 = smov 0  }
   0x9 LB: > { %s1107_s24 = sadd.s32 4294967295, %s1021_s23   ;;  %s1413_s25 = sadd.s32 4294967294, %s1021_s23   ;;  %s1021_s23 = sphi %s1086_s23, %s26_s23   ;;  %s1017_s22 = sphi %s1084_s22, %s1435_s22   ;;  %s1013_s21 = sphi %s1082_s21, %s1434_s21   ;;  %s1009_s20 = sphi %s1080_s20, %s1433_s20   ;;  %s1005_s19 = sphi %s1078_s19, %s1432_s19   ;;  %s1001_s18 = sphi %s1076_s18, %s1431_s18  }
   0xa   : > { %p60_p0 = scmp.ne.s32.totalorder %s1005_s19, %s1001_s18  ;;  %p1410_p1 = scmp.eq.s32.totalorder %s1107_s24, 0 }
   0xb   : > { %p134_p3 = scmp.eq.s32.totalorder %s1413_s25, 1  ;;  %p658_p5 = scmp.ge.s32.totalorder %s1021_s23, 1 }
   0xc   : > { %p1118_p4 = por %p1410_p1, %p60_p0  ;;  %p197_p7 = scmp.lt.s32.totalorder %s1021_s23, 3 }
   0xd   : > { %p1123_p6 = por %p134_p3, %p60_p0  ;;  %s1023_s29 = smov [#allocation5]  }
   0xe   : > { %s1414_s26 = scalar_select %p1118_p4, 1, 0 }
   0xf   : > { %s1415_s27 = scalar_select %p1123_p6, 1, 0 }
  0x10   : > { %p1128_p8 = pnand %p658_p5, %p197_p7  ;;  %s209_s30 = sshll.u32 %s1023_s29, 4  ;;  %s210_s30 = int_to_ptr.vmem [resolvable:$true] %s209_s30 }
  0x11   : > { %s38_s7 = sadd.s32 1, %s1017_s22  ;;  %s817_s10 = scalar_lea.hbm %s1405_s1, 512 }
  0x12   : > { %s1416_s28 = scalar_select %p1128_p8, 1, 0 }
  0x13   : > { %p728_p9 = pneg %p1128_p8  ;;  %p818_p12 = scmp.ne.s32.totalorder %s1405_s1, %s817_s10 }
  0x14   : > { %p824_p5 = scmp.lt.u32.totalorder %s817_s10, %s1405_s1 }
  0x15   : > { %p1137_p11 = pnand %p728_p9, %p1410_p1 }
  0x17   : > { %p819_p13 = pneg %p1137_p11 }
  0x19   : > { %p820_p0 = pnand %p819_p13, %p818_p12 }
  0x1b   : > { %p821_p3 = pneg %p820_p0 }
  0x1d   : > { %p826_p7 = pnand %p824_p5, %p821_p3 }
  0x1f   : > { %829 = shalt.err (!%p826_p7)
}
  0x20   : > { %s830_s15 = scalar_lea.vmem %s210_s30, 512  ;;  %p838_p2 = scmp.lt.s32.totalorder %s210_s30, %s210_s30 }
  0x21   : > { %p831_p9 = scmp.ne.s32.totalorder %s210_s30, %s830_s15  ;;  %p839_p6 = scmp.lt.s32.totalorder %s830_s15, %s830_s15 }
  0x23   : > { %p833_p10 = pnand %p831_p9, %p819_p13  ;;  %p840_p4 = por %p839_p6, %p838_p2 }
  0x25   : > { %p834_p1 = pneg %p833_p10 }
  0x27   : > { %p841_p8 = pnand %p840_p4, %p834_p1 }
  0x29   : > { %844 = shalt.err (!%p841_p8)
}
  0x2a   : > { %s1024_s16 = smov 128   ;;  %s1025_s17 = smov 8  }
  0x2b   : > { %731 = dma.hbm_to_vmem [thread:$0]  (!%p1137_p11), %s1405_s1, 512, %s210_s30, [#allocation6], %s1024_s16, %s1024_s16, %s1025_s17  }
  0x2c   : > { %p40_p1 = scmp.ge.s32.totalorder %s38_s7, 2  ;;  %s47_s9 = sadd.s32 1, %s1009_s20 }
  0x2d   : > { %p54_p2 = scmp.ne.s32.totalorder %s1009_s20, %s1005_s19  ;;  %p55_p4 = scmp.eq.s32.totalorder %s1021_s23, 0 }
  0x2e   : > { %s1437_s7 = smov (%p40_p1, %s38_s7), 0  ;;  %p1419_p8 = scmp.eq.s32.totalorder %s1107_s24, 1 }
  0x2f   : > { %p1164_p6 = por %p55_p4, %p54_p2  ;;  %s42_s6 = ssub.s32 %s1017_s22, %s1437_s7 }
  0x30   : > { %p1170_p10 = por %p1419_p8, %p54_p2  ;;  %p747_p12 = scmp.lt.s32.totalorder %s1021_s23, 2 }
  0x31   : > { %p45_p11 = scmp.eq.s32.totalorder %s42_s6, 0  ;;  %s226_s30 = sand.u32 1, %s1009_s20  }
  0x32   : > { %s661_s12 = sshll.u32 %s226_s30, 3  ;;  %s662_s14 = sshll.u32 %s1017_s22, 7 }
  0x33   : > { %s1179_s13 = scalar_select %p45_p11, %s1009_s20, %s47_s9  }
  0x34   : > { %s1185_s17 = scalar_lea.hbm %s1404_s0, %s662_s14  ;;  %s230_s29 = scalar_lea.vmem [#allocation2], %s661_s12 }
  0x35   : > { %s238_s8 = sshll.u32 %s230_s29, 4  ;;  %p1191_p13 = pnand %p747_p12, %p1164_p6  ;;  %s1187_s8 = int_to_ptr.vmem [resolvable:$true] %s238_s8 }
  0x36   : > { %s227_s9 = scalar_lea.sflag [#allocation3], %s226_s30  ;;  %s845_s25 = scalar_lea.hbm %s1185_s17, 128 }
  0x37   : > { %p846_p0 = scmp.ne.s32.totalorder %s1185_s17, %s845_s25  ;;  %p847_p3 = pneg %p1191_p13 }
  0x38   : > { %s850_s15 = scalar_lea.hbm %s1404_s0, 256  ;;  %p851_p9 = scmp.lt.u32.totalorder %s1185_s17, %s1404_s0 }
  0x39   : > { %p848_p5 = pnand %p847_p3, %p846_p0  ;;  %p852_p1 = scmp.lt.u32.totalorder %s850_s15, %s845_s25 }
  0x3a   : > { %p854_p4 = scmp.lt.u32.totalorder %s845_s25, %s1185_s17 }
  0x3b   : > { %p849_p7 = pneg %p848_p5  ;;  %p853_p2 = por %p852_p1, %p851_p9 }
  0x3d   : > { %p855_p6 = por %p854_p4, %p853_p2 }
  0x3f   : > { %p856_p8 = pnand %p855_p6, %p849_p7 }
  0x41   : > { %859 = shalt.err (!%p856_p8)
}
  0x42   : > { %s860_s30 = scalar_lea.vmem %s1187_s8, 128  ;;  %s1026_s29 = smov [#allocation2]  }
  0x43   : > { %p861_p12 = scmp.ne.s32.totalorder %s1187_s8, %s860_s30  ;;  %s865_s12 = sshll.u32 %s1026_s29, 4  ;;  %s866_s12 = int_to_ptr.vmem [resolvable:$false] %s865_s12 }
  0x44   : > { %s867_s14 = scalar_lea.vmem %s866_s12, 256  ;;  %p868_p5 = scmp.lt.s32.totalorder %s1187_s8, %s866_s12 }
  0x45   : > { %p863_p11 = pnand %p861_p12, %p847_p3  ;;  %p869_p9 = scmp.lt.s32.totalorder %s867_s14, %s860_s30 }
  0x47   : > { %p864_p0 = pneg %p863_p11  ;;  %p870_p1 = por %p869_p9, %p868_p5 }
  0x49   : > { %p871_p2 = pnand %p870_p1, %p864_p0 }
  0x4b   : > { %874 = shalt.err (!%p871_p2)
}
  0x4c   : > { %735 = dma.hbm_to_vmem [thread:$0]  (!%p1191_p13), %s1185_s17, 128, %s1187_s8, %s227_s9  }
  0x4d   : > { %p1422_p7 = scmp.ne.s32.totalorder %s1416_s28, 0 }
  0x4e   : > { %s1223_s25 = sand.u32 (!%p1422_p7), 1, %s1005_s19   ;;  %p1423_p3 = scmp.ne.s32.totalorder (!%p1422_p7), %s1414_s26, 0 }
  0x4f   : > { %247 = sbr.rel (%p1422_p7) target bundleno = 496 (0x1f0), region = 32  ;;  %s664_s15 = sshll.u32 (!%p1422_p7), %s1223_s25, 3 }
  0x50   : > { %s250_s10 = scalar_lea.sflag (!%p1422_p7), [#allocation3], %s1223_s25  ;;  %s253_s16 = scalar_lea.vmem (!%p1422_p7), [#allocation2], %s664_s15 }
  0x56   : > { %984 = dma.done.wait (%p1423_p3), %s250_s10, 128  }
  0x57   : > { %986 = vsyncadd (%p1423_p3), %s250_s10, 4294967168  ;;  %p1424_p4 = scmp.eq.s32.totalorder %s1107_s24, 0 }
  0x59   : > { %988 = dma.done.wait (%p1424_p4), [#allocation6], 512   ;;  %p1425_p13 = pmov %p1424_p4 }
  0x5a   : > { %v1027_v0 = vmov 0.0|0.0   ;;  %vm1028_vm0 = vmmov 0   ;;  %v1029_v1 = vmov 0.0   ;;  %v295_v2 = vld [vmem:[#allocation5] sm:$0xff]  ;;  %v296_v3 = vld [vmem:[#allocation5 + $0x8] sm:$0xff]  ;;  %v297_v4 = vld [vmem:[#allocation5 + $0x10] sm:$0xff] }
  0x5b   : > { %990 = vsyncadd (%p1425_p13), [#allocation6], 4294966784  ;;  %710 = vmatprep.subr.bf16.mxu0 %v1027_v0  ;;  %707 = vmatprep.mubr.msk.f32.mxu0 %vm1028_vm0, %v1029_v1  ;;  %v711_v5 = vpack.c.bf16 %v296_v3, %v295_v2  ;;  %v298_v6 = vld [vmem:[#allocation5 + $0x18] sm:$0xff]  ;;  %vm306_vm1 = vcmask 261120   ;;  %v669_v9 = vld [vmem:[%s1406_s2] ss:$0 sm:$0xff] }
  0x5c   : > { %v714_v7 = vpack.c.bf16 %v298_v6, %v297_v4  ;;  %v294_v8 = vld [vmem:[%s253_s16] sm:$0xff]  ;;  %s1239_s17 = sshll.u32 %s1223_s25, 5  ;;  %vm381_vm2 = vcmask 64512   ;;  %s1030_s8 = smov 80  }
  0x5d   : > { %712 = vmatpush3.bf16.msra.mxu0 %v711_v5  ;;  %s1031_s6 = smov 96   ;;  %s1242_s9 = scalar_lea.vmem [#allocation7], %s1239_s17 }
  0x5e   : > { %713 = vmatprep.subr.bf16.mxu0 %v1027_v0  ;;  %s1032_s30 = smov 72   ;;  %s1033_s29 = smov 88  }
  0x5f   : > { %s1034_s12 = smov 64   ;;  %s1035_s14 = smov 120  }
  0x60   : > { %s1036_s15 = smov 56   ;;  %s1037_s10 = smov 112  }
  0x61   : > { %715 = vmatpush3.bf16.msra.mxu0 %v714_v7  ;;  %s1038_s16 = smov 48   ;;  %s1039_s26 = smov 104  }
  0x62   : > { %s1040_s28 = smov 40  }
  0x64   : > { %708 = vmatmul.mubr.msk.f32.vlgmr.msra.gmra.mrb[0].mxu0 %vm306_vm1, %v294_v8 }
 0x137   : > { %v376_v10 = vpop.f32.mrb[0].mxu0 }
 0x138   : > { %v377_v11 = vadd.f32 %v669_v9, %v376_v10  ;;  %v709_v12 = vpop.f32.mrb[1].mxu0 }
 0x13a   : > { %413 = vrot.lane.b32.xlu1 %v377_v11, %s1030_s8  ;;  %384 = vrot.lane.b32.xlu0 %v377_v11, %s1031_s6  ;;  %v380_v13 = vmul.f32 0.35355338, %v377_v11  ;;  %s286_s8 = scalar_lea.vmem [#allocation8], %s1239_s17 }
 0x13b   : > { %s480_s6 = sshll.u32 %s286_s8, 4  ;;  %s1251_s6 = int_to_ptr.vmem [resolvable:$true] %s480_s6 }
 0x13c   : > { %382 = vst.msk [vmem:[%s1242_s9] sm:$0xff] %vm381_vm2, %v380_v13 }
 0x13e   : > { %428 = vrot.lane.b32.xlu1 %v377_v11, %s1032_s30  ;;  %398 = vrot.lane.b32.xlu0 %v377_v11, %s1033_s29  ;;  %s443_s30 = sand.u32 1, %s1107_s24   ;;  %s1249_s29 = sshll.u32 %s1013_s21, 9 }
 0x13f   : > { %s1263_s21 = scalar_lea.sflag [#allocation9], %s443_s30  ;;  %s875_s24 = scalar_lea.vmem %s1251_s6, 512 }
 0x140   : > { %p876_p6 = scmp.ne.s32.totalorder %s1251_s6, %s875_s24 }
 0x142   : > { %388 = vrot.lane.b32.xlu0 %v377_v11, %s1034_s12  ;;  %393 = vrot.lane.b32.xlu1 %v380_v13, %s1035_s14  ;;  %p877_p8 = pnand %p876_p6, %p1170_p10 }
 0x144   : > { %p878_p12 = pneg %p877_p8 }
 0x146   : > { %403 = vrot.lane.b32.xlu0 %v377_v11, %s1036_s15  ;;  %408 = vrot.lane.b32.xlu1 %v380_v13, %s1037_s10  ;;  %s1259_s15 = scalar_lea.hbm %s1408_s4, %s1249_s29  ;;  %s1041_s10 = smov [#allocation8]  }
 0x14a   : > { %418 = vrot.lane.b32.xlu0 %v377_v11, %s1038_s16  ;;  %423 = vrot.lane.b32.xlu1 %v380_v13, %s1039_s26  ;;  %s879_s16 = sshll.u32 %s1041_s10, 4  ;;  %s880_s16 = int_to_ptr.vmem [resolvable:$false] %s879_s16 }
 0x14b   : > { %s881_s26 = scalar_lea.vmem %s880_s16, 1024  ;;  %p882_p11 = scmp.lt.s32.totalorder %s1251_s6, %s880_s16 }
 0x14c   : > { %p883_p0 = scmp.lt.s32.totalorder %s881_s26, %s875_s24 }
 0x14e   : > { %433 = vrot.lane.b32.xlu0 %v377_v11, %s1040_s28  ;;  %p884_p5 = por %p883_p0, %p882_p11 }
 0x150   : > { %p885_p9 = pnand %p884_p5, %p878_p12 }
 0x1ac   : > { %v414_v14 = vpop.permute.xlu1 %413  ;;  %v385_v15 = vpop.permute.xlu0 %384 }
 0x1ad   : > { %675 = vst.msk [vmem:[%s286_s8 + $0x10] sm:$0xff] %vm381_vm2, %v414_v14  ;;  %387 = vst.msk [vmem:[%s286_s8] sm:$0xff] %vm381_vm2, %v385_v15 }
 0x1b0   : > { %v429_v16 = vpop.permute.xlu1 %428  ;;  %v399_v17 = vpop.permute.xlu0 %398 }
 0x1b1   : > { %678 = vst.msk [vmem:[%s286_s8 + $0x18] sm:$0xff] %vm381_vm2, %v429_v16  ;;  %672 = vst.msk [vmem:[%s286_s8 + $0x8] sm:$0xff] %vm381_vm2, %v399_v17 }
 0x1b2   : > { %888 = shalt.err (!%p885_p9)
}
 0x1b3   : > { %s889_s28 = scalar_lea.hbm %s1259_s15, 512  ;;  %s893_s12 = scalar_lea.hbm %s1408_s4, 1024 }
 0x1b4   : > { %p890_p1 = scmp.ne.s32.totalorder %s1259_s15, %s889_s28  ;;  %p894_p3 = scmp.lt.u32.totalorder %s1259_s15, %s1408_s4 }
 0x1b5   : > { %p895_p4 = scmp.lt.u32.totalorder %s893_s12, %s889_s28  ;;  %p897_p6 = scmp.lt.u32.totalorder %s889_s28, %s1259_s15 }
 0x1b6   : > { %p891_p2 = pnand %p890_p1, %p1170_p10 }
 0x1b7   : > { %p896_p13 = por %p895_p4, %p894_p3 }
 0x1b8   : > { %p892_p7 = pneg %p891_p2 }
 0x1b9   : > { %p898_p8 = por %p897_p6, %p896_p13 }
 0x1bb   : > { %p899_p12 = pnand %p898_p8, %p892_p7 }
 0x1bd   : > { %902 = shalt.err (!%p899_p12)
}
 0x1be   : > { %s1042_s24 = smov 128   ;;  %s1043_s16 = smov 8   ;;  %v389_v18 = vpop.permute.xlu0 %388  ;;  %v394_v19 = vpop.permute.xlu1 %393 }
 0x1bf   : > { %723 = dma.vmem_to_hbm [thread:$0]  (%p1170_p10), %s1251_s6, 512, %s1259_s15, %s1263_s21, %s1042_s24, %s1042_s24, %s1043_s16  }
 0x1c0   : > { %s1291_s26 = scalar_lea.vmem [#allocation10], %s1239_s17  ;;  %671 = vst.msk [vmem:[%s1242_s9 + $0x8] sm:$0xff] %vm381_vm2, %v394_v19  ;;  %s463_s28 = sshll.u32 %s1242_s9, 4  ;;  %s1302_s28 = int_to_ptr.vmem [resolvable:$true] %s463_s28 }
 0x1c1   : > { %391 = vst.msk [vmem:[%s1291_s26] sm:$0xff] %vm381_vm2, %v389_v18  ;;  %s1308_s15 = scalar_lea.hbm %s1407_s3, %s1249_s29  ;;  %s903_s12 = scalar_lea.vmem %s1302_s28, 512 }
 0x1c2   : > { %v404_v20 = vpop.permute.xlu0 %403  ;;  %v409_v21 = vpop.permute.xlu1 %408  ;;  %p904_p11 = scmp.ne.s32.totalorder %s1302_s28, %s903_s12  ;;  %s1044_s14 = smov [#allocation7]  }
 0x1c3   : > { %673 = vst.msk [vmem:[%s1291_s26 + $0x8] sm:$0xff] %vm381_vm2, %v404_v20  ;;  %674 = vst.msk [vmem:[%s1242_s9 + $0x10] sm:$0xff] %vm381_vm2, %v409_v21  ;;  %s907_s10 = sshll.u32 %s1044_s14, 4  ;;  %s908_s10 = int_to_ptr.vmem [resolvable:$false] %s907_s10 }
 0x1c4   : > { %p905_p0 = pnand %p904_p11, %p1170_p10  ;;  %s909_s17 = scalar_lea.vmem %s908_s10, 1024 }
 0x1c5   : > { %p910_p9 = scmp.lt.s32.totalorder %s1302_s28, %s908_s10  ;;  %p911_p1 = scmp.lt.s32.totalorder %s909_s17, %s903_s12 }
 0x1c6   : > { %v419_v22 = vpop.permute.xlu0 %418  ;;  %v424_v23 = vpop.permute.xlu1 %423  ;;  %p906_p5 = pneg %p905_p0 }
 0x1c7   : > { %676 = vst.msk [vmem:[%s1291_s26 + $0x10] sm:$0xff] %vm381_vm2, %v419_v22  ;;  %677 = vst.msk [vmem:[%s1242_s9 + $0x18] sm:$0xff] %vm381_vm2, %v424_v23  ;;  %p912_p2 = por %p911_p1, %p910_p9 }
 0x1c9   : > { %p913_p7 = pnand %p912_p2, %p906_p5 }
 0x1cb   : > { %916 = shalt.err (!%p913_p7)
}
 0x1cc   : > { %s917_s9 = scalar_lea.hbm %s1308_s15, 512  ;;  %s921_s14 = scalar_lea.hbm %s1407_s3, 1024 }
 0x1cd   : > { %p918_p3 = scmp.ne.s32.totalorder %s1308_s15, %s917_s9  ;;  %p922_p6 = scmp.lt.u32.totalorder %s1308_s15, %s1407_s3 }
 0x1ce   : > { %p923_p8 = scmp.lt.u32.totalorder %s921_s14, %s917_s9  ;;  %p925_p11 = scmp.lt.u32.totalorder %s917_s9, %s1308_s15 }
 0x1cf   : > { %p919_p4 = pnand %p918_p3, %p1170_p10 }
 0x1d0   : > { %p924_p12 = por %p923_p8, %p922_p6 }
 0x1d1   : > { %p920_p13 = pneg %p919_p4 }
 0x1d2   : > { %p926_p0 = por %p925_p11, %p924_p12 }
 0x1d4   : > { %p927_p5 = pnand %p926_p0, %p920_p13 }
 0x1d6   : > { %930 = shalt.err (!%p927_p5)
}
 0x1d7   : > { %s1426_s12 = scalar_lea.sflag [#allocation4], %s1223_s25  ;;  %s1427_s8 = sshll.u32 %s1291_s26, 4  ;;  %v434_v24 = vpop.permute.xlu0 %433  ;;  %s1344_s8 = int_to_ptr.vmem [resolvable:$true] %s1427_s8 }
 0x1d8   : > { %722 = dma.vmem_to_hbm [thread:$0]  (%p1170_p10), %s1302_s28, 512, %s1308_s15, %s1426_s12, %s1042_s24, %s1042_s24, %s1043_s16  }
 0x1d9   : > { %s1350_s9 = scalar_lea.hbm %s1409_s5, %s1249_s29  ;;  %679 = vst.msk [vmem:[%s1291_s26 + $0x18] sm:$0xff] %vm381_vm2, %v434_v24  ;;  %s931_s25 = scalar_lea.vmem %s1344_s8, 512 }
 0x1da   : > { %p932_p9 = scmp.ne.s32.totalorder %s1344_s8, %s931_s25  ;;  %s1045_s28 = smov [#allocation10]  }
 0x1db   : > { %s935_s15 = sshll.u32 %s1045_s28, 4  ;;  %s936_s15 = int_to_ptr.vmem [resolvable:$false] %s935_s15 }
 0x1dc   : > { %p933_p1 = pnand %p932_p9, %p1170_p10  ;;  %s937_s6 = scalar_lea.vmem %s936_s15, 1024 }
 0x1dd   : > { %p938_p7 = scmp.lt.s32.totalorder %s1344_s8, %s936_s15  ;;  %p939_p3 = scmp.lt.s32.totalorder %s937_s6, %s931_s25 }
 0x1de   : > { %p934_p2 = pneg %p933_p1 }
 0x1df   : > { %p940_p4 = por %p939_p3, %p938_p7 }
 0x1e1   : > { %p941_p13 = pnand %p940_p4, %p934_p2 }
 0x1e3   : > { %944 = shalt.err (!%p941_p13)
}
 0x1e4   : > { %s945_s29 = scalar_lea.hbm %s1350_s9, 512  ;;  %s949_s10 = scalar_lea.hbm %s1409_s5, 1024 }
 0x1e5   : > { %p946_p6 = scmp.ne.s32.totalorder %s1350_s9, %s945_s29  ;;  %p950_p11 = scmp.lt.u32.totalorder %s1350_s9, %s1409_s5 }
 0x1e6   : > { %p951_p0 = scmp.lt.u32.totalorder %s949_s10, %s945_s29  ;;  %p953_p9 = scmp.lt.u32.totalorder %s945_s29, %s1350_s9 }
 0x1e7   : > { %p947_p8 = pnand %p946_p6, %p1170_p10 }
 0x1e8   : > { %p952_p5 = por %p951_p0, %p950_p11 }
 0x1e9   : > { %p948_p12 = pneg %p947_p8 }
 0x1ea   : > { %p954_p1 = por %p953_p9, %p952_p5 }
 0x1ec   : > { %p955_p2 = pnand %p954_p1, %p948_p12 }
 0x1ee   : > { %958 = shalt.err (!%p955_p2)
}
 0x1ef   : > { %724 = dma.vmem_to_hbm [thread:$0]  (%p1170_p10), %s1344_s8, 512, %s1350_s9, %s1263_s21, %s1042_s24, %s1042_s24, %s1043_s16  }
 0x1f0 PF: > { %s512_s17 = sand.u32 1, %s1001_s18   ;;  %p1428_p7 = scmp.ne.s32.totalorder %s1415_s27, 0 }
 0x1f1   : > { %p1429_p3 = scmp.ge.s32.totalorder %s1021_s23, 2  ;;  %s513_s25 = scalar_lea.sflag [#allocation4], %s512_s17 }
 0x1f3   : > { %p737_p4 = pnand %p1429_p3, %p1428_p7 }
 0x1f5   : > { %992 = dma.done.wait (!%p737_p4), %s513_s25, 512  }
 0x1f6   : > { %994 = vsyncadd (!%p737_p4), %s513_s25, 4294966784  ;;  %s1430_s11 = sadd.s32 4294967294, %s1021_s23  }
 0x1f7   : > { %s521_s28 = sand.u32 1, %s1430_s11  }
 0x1f8   : > { %s522_s15 = scalar_lea.sflag [#allocation9], %s521_s28 }
 0x1f9   : > { %996 = dma.done.wait (!%p737_p4), %s522_s15, 1024  }
 0x1fa   : > { %998 = vsyncadd (!%p737_p4), %s522_s15, 4294966272  ;;  %s26_s23 = sadd.s32 1, %s1021_s23   ;;  %s1431_s18 = smov %s1005_s19 }
 0x1fb   : > { %p23_p10 = scmp.ge.s32.totalorder %s26_s23, 4   ;;  %s1432_s19 = smov %s1009_s20 }
 0x1fc   : > { %s1433_s20 = smov %s1179_s13  ;;  %s1434_s21 = smov %s1017_s22 }
 0x1fd   : > { %s1435_s22 = smov %s1437_s7  ;;  %25 = sbr.rel (!%p23_p10) target bundleno = 9 (0x9), region = 122 }
 0x204   :  { %536 = vsyncpa [#allocation3], 1 }
 0x205   :  { %538 = vsyncpa [#allocation3 + $0x1], 1 }
 0x206   :  { %539 = vsyncpa [#allocation6], 1 }
 0x207   :  { %540 = vsyncpa [#allocation4], 1 }
 0x208   :  { %542 = vsyncpa [#allocation4 + $0x1], 1 }
 0x209   :  { %543 = vsyncpa [#allocation9], 1 }
 0x20a   :  { %545 = vsyncpa [#allocation9 + $0x1], 1 }

</bundles_post_ra>
